<compile_context>
chip_gen: v7x
topology: tpu7x:2x2x1
jax: 0.10.0
libtpu: 0.0.40
codegen_flags: <defaults>
</compile_context>

<pallas_src>
import functools

import jax
import jax.numpy as jnp
from jax.experimental import pallas as pl
from jax.experimental.pallas import tpu as pltpu


def _round_up(x, m):
    return (x + m - 1) // m * m


def _pick_tile(dim_padded, preferred, align):
    """Largest multiple of `align` that divides `dim_padded` and is <= preferred."""
    preferred = max(align, min(preferred, dim_padded))
    best = align
    for t in range(align, preferred + 1, align):
        if dim_padded % t == 0:
            best = t
    return best


def _footprint_bytes(tm, tn, tk, in_bytes, out_bytes):
    # Double-buffered x / w / bias input tiles + double-buffered output tile
    # + the f32 accumulator scratch.
    return (2 * (tm * tk + tk * tn + tn) * in_bytes
            + 2 * tm * tn * out_bytes
            + tm * tn * 4)


def _linear_relu_kernel(x_ref, w_ref, b_ref, o_ref, acc_ref):
    k = pl.program_id(2)

    @pl.when(k == 0)
    def _init():
        acc_ref[...] = jnp.zeros_like(acc_ref)

    # MXU matmul tile, f32 accumulation.
    acc_ref[...] += jnp.dot(
        x_ref[...], w_ref[...], preferred_element_type=jnp.float32
    )

    @pl.when(k == pl.num_programs(2) - 1)
    def _finalize():
        out = acc_ref[...] + b_ref[...].astype(jnp.float32)  # [1, tn] broadcast
        o_ref[...] = jnp.maximum(out, 0.0).astype(o_ref.dtype)


@functools.partial(jax.jit, static_argnames=("tm", "tn", "tk", "cast_to_bf16"))
def linear_bn_relu(x, w, b, *, tm=1024, tn=1024, tk=2048, cast_to_bf16=False):
    """out = relu(x @ w + b).  x:[B,in_ch], w:[in_ch,out_ch], b:[out_ch]."""
    B, in_ch = x.shape
    out_ch = w.shape[1]
    out_dtype = x.dtype

    # ---- Pad only to hardware alignment (NOT full tile multiples) ----------
    m_pad = _round_up(B, 8)        # sublane
    k_pad = _round_up(in_ch, 128)  # lane
    n_pad = _round_up(out_ch, 128)

    in_dtype = jnp.bfloat16 if (cast_to_bf16 and x.dtype == jnp.float32) else x.dtype
    in_bytes = jnp.dtype(in_dtype).itemsize
    out_bytes = jnp.dtype(out_dtype).itemsize

    # ---- Divisor-aware tile selection ---------------------------------------
    tm = _pick_tile(m_pad, tm, 8)
    tn = _pick_tile(n_pad, tn, 128)
    tk = _pick_tile(k_pad, tk, 128)

    # Keep double-buffered tiles + accumulator within a budget that is safe on
    # every generation (v7x has only 64 MiB VMEM per TensorCore).
    VMEM_BUDGET = 40 * 1024 * 1024
    for _ in range(64):
        if _footprint_bytes(tm, tn, tk, in_bytes, out_bytes) <= VMEM_BUDGET:
            break
        if tk > 128:                              # tk doesn't change HBM traffic
            tk = _pick_tile(k_pad, tk // 2, 128)
        elif tn > 128:
            tn = _pick_tile(n_pad, tn // 2, 128)
        elif tm > 8:
            tm = _pick_tile(m_pad, max(tm // 2, 8), 8)
        else:
            break

    # ---- v7x megacore: keep >= 2 tiles in the parallel (M, N) grid ----------
    if (m_pad // tm) * (n_pad // tn) < 2:
        if m_pad // 8 >= 2:
            tm = _pick_tile(m_pad, max(8, tm // 2), 8)
        elif n_pad // 128 >= 2:
            tn = _pick_tile(n_pad, max(128, tn // 2), 128)

    # ---- Conditional padding (skip the HBM copy when nothing to pad) --------
    pm, pk, pn = m_pad - B, k_pad - in_ch, n_pad - out_ch
    x_p = jnp.pad(x, ((0, pm), (0, pk))) if (pm or pk) else x
    w_p = jnp.pad(w, ((0, pk), (0, pn))) if (pk or pn) else w
    b2 = b.reshape(1, -1)
    b_p = jnp.pad(b2, ((0, 0), (0, pn))) if pn else b2

    if in_dtype != x.dtype:  # optional bf16 fast path (f32 accumulation kept)
        x_p = x_p.astype(in_dtype)
        w_p = w_p.astype(in_dtype)

    grid = (m_pad // tm, n_pad // tn, k_pad // tk)

    # ---- VMEM limit derived from the real tile footprint --------------------
    footprint = _footprint_bytes(tm, tn, tk, in_bytes, out_bytes)
    vmem_limit = int(min(max(footprint * 5 // 4 + (2 << 20), 8 << 20), 56 << 20))

    out_p = pl.pallas_call(
        _linear_relu_kernel,
        out_shape=jax.ShapeDtypeStruct((m_pad, n_pad), out_dtype),
        grid_spec=pltpu.PrefetchScalarGridSpec(
            num_scalar_prefetch=0,
            grid=grid,
            in_specs=[
                pl.BlockSpec((tm, tk), lambda i, j, k: (i, k)),   # x tile
                pl.BlockSpec((tk, tn), lambda i, j, k: (k, j)),   # w tile
                pl.BlockSpec((1, tn), lambda i, j, k: (0, j)),    # bias (K-invariant)
            ],
            out_specs=pl.BlockSpec((tm, tn), lambda i, j, k: (i, j)),
            scratch_shapes=[pltpu.VMEM((tm, tn), jnp.float32)],
        ),
        compiler_params=pltpu.CompilerParams(
            dimension_semantics=("parallel", "parallel", "arbitrary"),
            vmem_limit_bytes=vmem_limit,
        ),
    )(x_p, w_p, b_p)

    if pm == 0 and pn == 0:
        return out_p
    return out_p[:B, :out_ch]


if __name__ == "__main__":
    key = jax.random.PRNGKey(0)

    # --- Test 1: small shapes matching the module's toy usage (f32) ---------
    batch, in_ch, out_ch = 8, 32, 64
    kx, kw, kb, key = jax.random.split(key, 4)

    bound = 1.0 / (in_ch ** 0.5)  # PyTorch nn.Linear default init bound
    w_torch = jax.random.uniform(kw, (out_ch, in_ch), jnp.float32, -bound, bound)
    b_torch = jax.random.uniform(kb, (out_ch,), jnp.float32, -bound, bound)
    x = jax.random.normal(kx, (batch, in_ch), jnp.float32)

    w = w_torch.T            # pre-transpose ONCE (init-time), not in the hot path
    b = b_torch

    out = linear_bn_relu(x, w, b)
    jax.block_until_ready(out)

    ref = jnp.maximum(x @ w_torch.T + b_torch, 0.0)
    assert out.shape == (batch, out_ch)
    assert jnp.allclose(out, ref, atol=1e-5, rtol=1e-5)

    # --- Test 2: larger shapes; divisor-aware tiling + megacore split (f32) --
    B2, IN2, OUT2 = 512, 1024, 384   # n_pad stays 384 (no tile round-up waste)
    k1, k2, k3, key = jax.random.split(key, 4)
    bound2 = 1.0 / (IN2 ** 0.5)
    w2 = jax.random.uniform(k1, (IN2, OUT2), jnp.float32, -bound2, bound2)
    b2 = jax.random.uniform(k2, (OUT2,), jnp.float32, -bound2, bound2)
    x2 = jax.random.normal(k3, (B2, IN2), jnp.float32)

    out2 = linear_bn_relu(x2, w2, b2)
    jax.block_until_ready(out2)
    ref2 = jnp.maximum(x2 @ w2 + b2, 0.0)
    assert out2.shape == (B2, OUT2)
    assert jnp.allclose(out2, ref2, atol=1e-4, rtol=1e-4)

    # --- Test 3: bf16 operands, f32 accumulation (MXU throughput path) ------
    out3 = linear_bn_relu(
        x2.astype(jnp.bfloat16), w2.astype(jnp.bfloat16), b2.astype(jnp.bfloat16)
    )
    jax.block_until_ready(out3)
    assert jnp.allclose(out3.astype(jnp.float32), ref2, atol=1e-1, rtol=5e-2)

    # --- Test 4: f32 inputs with in-wrapper bf16 cast (opt-in fast path) ----
    out4 = linear_bn_relu(x2, w2, b2, cast_to_bf16=True)
    jax.block_until_ready(out4)
    assert out4.dtype == jnp.float32
    assert jnp.allclose(out4, ref2, atol=1e-1, rtol=5e-2)

    print("KERNEL_OK")
</pallas_src>

<mosaic_0001>
module attributes {stable_mosaic.version = 11 : i64} {
  func.func @_linear_relu_kernel(%arg0: i32, %arg1: i32, %arg2: i32, %arg3: memref<8x128xf32, #tpu.memory_space<vmem>>, %arg4: memref<128x128xf32, #tpu.memory_space<vmem>>, %arg5: memref<1x128xf32, #tpu.memory_space<vmem>>, %arg6: memref<8x128xf32, #tpu.memory_space<vmem>>, %arg7: memref<8x128xf32, #tpu.memory_space<vmem>>) attributes {dimension_semantics = [#tpu.dimension_semantics<parallel>, #tpu.dimension_semantics<parallel>, #tpu.dimension_semantics<arbitrary>], iteration_bounds = array<i64: 1, 1, 1>, scalar_prefetch = 0 : i64, scratch_operands = 1 : i64, tpu.core_type = #tpu.core_type<tc>, window_params = [{transform_indices = @transform_0, window_bounds = array<i64: 8, 128>}, {transform_indices = @transform_1, window_bounds = array<i64: 128, 128>}, {transform_indices = @transform_2, window_bounds = array<i64: 1, 128>}, {transform_indices = @transform_3, window_bounds = array<i64: 8, 128>}]} {
    %c0_i32 = arith.constant 0 : i32
    %0 = arith.cmpi eq, %arg2, %c0_i32 : i32
    %1 = arith.extui %0 : i1 to i32
    %c0_i32_0 = arith.constant 0 : i32
    %2 = arith.cmpi ne, %1, %c0_i32_0 : i32
    scf.if %2 {
      %cst_10 = arith.constant 0.000000e+00 : f32
      %12 = vector.broadcast %cst_10 : f32 to vector<8x128xf32>
      %c0_11 = arith.constant 0 : index
      %c0_12 = arith.constant 0 : index
      %13 = vector.load %arg7[%c0_11, %c0_12] : memref<8x128xf32, #tpu.memory_space<vmem>>, vector<8x128xf32>
      tpu.vector_store %arg7[%c0_11, %c0_12], %12 {strides = array<i32>} : memref<8x128xf32, #tpu.memory_space<vmem>>, vector<8x128xf32>,
    } else {
    }
    %c0 = arith.constant 0 : index
    %c0_1 = arith.constant 0 : index
    %3 = vector.load %arg7[%c0, %c0_1] : memref<8x128xf32, #tpu.memory_space<vmem>>, vector<8x128xf32>
    %c0_2 = arith.constant 0 : index
    %c0_3 = arith.constant 0 : index
    %4 = vector.load %arg3[%c0_2, %c0_3] : memref<8x128xf32, #tpu.memory_space<vmem>>, vector<8x128xf32>
    %c0_4 = arith.constant 0 : index
    %c0_5 = arith.constant 0 : index
    %5 = vector.load %arg4[%c0_4, %c0_5] : memref<128x128xf32, #tpu.memory_space<vmem>>, vector<128x128xf32>
    %cst = arith.constant dense<0.000000e+00> : vector<8x128xf32>
    %6 = tpu.matmul %4, %5, %cst {dimension_numbers = #tpu.dot_dimension_numbers<[1], [0], [0], [1], [0, 0, 1, 1], [], []>} : vector<8x128xf32>, vector<128x128xf32>, vector<8x128xf32> -> vector<8x128xf32>
    %7 = arith.addf %3, %6 : vector<8x128xf32>
    %c0_6 = arith.constant 0 : index
    %c0_7 = arith.constant 0 : index
    %8 = vector.load %arg7[%c0_6, %c0_7] : memref<8x128xf32, #tpu.memory_space<vmem>>, vector<8x128xf32>
    tpu.vector_store %arg7[%c0_6, %c0_7], %7 {strides = array<i32>} : memref<8x128xf32, #tpu.memory_space<vmem>>, vector<8x128xf32>,
    %c0_i32_8 = arith.constant 0 : i32
    %9 = arith.cmpi eq, %arg2, %c0_i32_8 : i32
    %10 = arith.extui %9 : i1 to i32
    %c0_i32_9 = arith.constant 0 : i32
    %11 = arith.cmpi ne, %10, %c0_i32_9 : i32
    scf.if %11 {
      %c0_10 = arith.constant 0 : index
      %c0_11 = arith.constant 0 : index
      %12 = vector.load %arg7[%c0_10, %c0_11] : memref<8x128xf32, #tpu.memory_space<vmem>>, vector<8x128xf32>
      %c0_12 = arith.constant 0 : index
      %c0_13 = arith.constant 0 : index
      %13 = vector.load %arg5[%c0_12, %c0_13] : memref<1x128xf32, #tpu.memory_space<vmem>>, vector<1x128xf32>
      %14 = vector.broadcast %13 : vector<1x128xf32> to vector<8x128xf32>
      %15 = arith.addf %12, %14 : vector<8x128xf32>
      %cst_14 = arith.constant 0.000000e+00 : f32
      %16 = vector.broadcast %cst_14 : f32 to vector<8x128xf32>
      %17 = arith.maximumf %15, %16 : vector<8x128xf32>
      %c0_15 = arith.constant 0 : index
      %c0_16 = arith.constant 0 : index
      %18 = vector.load %arg6[%c0_15, %c0_16] : memref<8x128xf32, #tpu.memory_space<vmem>>, vector<8x128xf32>
      tpu.vector_store %arg6[%c0_15, %c0_16], %17 {strides = array<i32>} : memref<8x128xf32, #tpu.memory_space<vmem>>, vector<8x128xf32>,
    } else {
    }
    return
  }
  func.func @transform_0(%arg0: i32, %arg1: i32, %arg2: i32) -> (i32, i32) {
    %c0_i32 = arith.constant 0 : i32
    return %arg0, %arg2 : i32, i32
  }
  func.func @transform_1(%arg0: i32, %arg1: i32, %arg2: i32) -> (i32, i32) {
    %c0_i32 = arith.constant 0 : i32
    return %arg2, %arg1 : i32, i32
  }
  func.func @transform_2(%arg0: i32, %arg1: i32, %arg2: i32) -> (i32, i32) {
    %c0_i32 = arith.constant 0 : i32
    %c0_i32_0 = arith.constant 0 : i32
    return %c0_i32, %arg1 : i32, i32
  }
  func.func @transform_3(%arg0: i32, %arg1: i32, %arg2: i32) -> (i32, i32) {
    %c0_i32 = arith.constant 0 : i32
    return %arg0, %arg1 : i32, i32
  }
}

</mosaic_0001>

<bundles_post_ra>
// kernel: linear_bn_relu.1
= control target key start
LH: loop header
LB: loop body
LE: loop exit
PB: predicated region body
PF: predicated region fallthrough
CT: control target
= control target key end

     0   :  { %v243_v3 = vmov 0.0|0.0   ;;  %vm244_vm0 = vmmov 0   ;;  %v245_v6 = vmov 0.0   ;;  %s333_s0 = inlined_call_operand.vmem [shape: f32[8,128], index: 0, kind: input, shape index: {}]   ;;  %s334_s1 = inlined_call_operand.vmem [shape: f32[128,128], index: 1, kind: input, shape index: {}]   ;;  %s335_s2 = inlined_call_operand.vmem [shape: f32[1,128], index: 2, kind: input, shape index: {}]   ;;  %s336_s3 = inlined_call_operand.hbm [shape: f32[8,128], index: 3, kind: output, shape index: {}]  }
   0x1   :  { %v22_v0 = vld [vmem:[%s334_s1] sm:$0xff]  ;;  %v23_v1 = vld [vmem:[%s334_s1 + $0x8] sm:$0xff]  ;;  %v24_v2 = vld [vmem:[%s334_s1 + $0x10] sm:$0xff]  ;;  %191 = vmatprep.subr.bf16.mxu0 %v243_v3  ;;  %188 = vmatprep.mubr.msk.f32.mxu0 %vm244_vm0, %v245_v6 }
   0x2   :  { %v192_v4 = vpack.c.bf16 %v23_v1, %v22_v0  ;;  %v25_v5 = vld [vmem:[%s334_s1 + $0x18] sm:$0xff]  ;;  %v26_v8 = vld [vmem:[%s334_s1 + $0x20] sm:$0xff]  ;;  %v27_v9 = vld [vmem:[%s334_s1 + $0x28] sm:$0xff] }
   0x3   :  { %v195_v7 = vpack.c.bf16 %v25_v5, %v24_v2 }
   0x4   :  { %193 = vmatpush3.bf16.msra.mxu0 %v192_v4 }
   0x5   :  { %194 = vmatprep.subr.bf16.mxu0 %v243_v3 }
   0x6   :  { %8 = vsyncpa [#allocation4], 0  ;;  %v198_v10 = vpack.c.bf16 %v27_v9, %v26_v8  ;;  %v28_v11 = vld [vmem:[%s334_s1 + $0x30] sm:$0xff]  ;;  %v29_v12 = vld [vmem:[%s334_s1 + $0x38] sm:$0xff]  ;;  %s246_s21 = smov [#allocation3]  }
   0x7   :  { %v201_v13 = vpack.c.bf16 %v29_v12, %v28_v11  ;;  %v30_v14 = vld [vmem:[%s334_s1 + $0x40] sm:$0xff]  ;;  %v31_v15 = vld [vmem:[%s334_s1 + $0x48] sm:$0xff]  ;;  %v32_v17 = vld [vmem:[%s334_s1 + $0x50] sm:$0xff]  ;;  %s130_s22 = sshll.u32 %s246_s21, 4  ;;  %s131_s22 = int_to_ptr.vmem [resolvable:$true] %s130_s22 }
   0x8   :  { %196 = vmatpush3.bf16.msra.mxu0 %v195_v7  ;;  %v204_v16 = vpack.c.bf16 %v31_v15, %v30_v14  ;;  %v33_v18 = vld [vmem:[%s334_s1 + $0x58] sm:$0xff]  ;;  %v34_v20 = vld [vmem:[%s334_s1 + $0x60] sm:$0xff]  ;;  %v35_v21 = vld [vmem:[%s334_s1 + $0x68] sm:$0xff]  ;;  %p224_p1 = scmp.lt.s32.totalorder %s131_s22, %s131_s22 }
   0x9   :  { %197 = vmatprep.subr.bf16.mxu0 %v243_v3  ;;  %v207_v19 = vpack.c.bf16 %v33_v18, %v32_v17  ;;  %v210_v22 = vpack.c.bf16 %v35_v21, %v34_v20  ;;  %v36_v23 = vld [vmem:[%s334_s1 + $0x70] sm:$0xff]  ;;  %v37_v24 = vld [vmem:[%s334_s1 + $0x78] sm:$0xff]  ;;  %v21_v26 = vld [vmem:[%s333_s0] sm:$0xff]  ;;  %s219_s1 = scalar_lea.vmem %s131_s22, 128 }
   0xa   :  { %v213_v25 = vpack.c.bf16 %v37_v24, %v36_v23  ;;  %v138_v27 = vld [vmem:[%s335_s2] ss:$0 sm:$0xff]  ;;  %p220_p0 = scmp.ne.s32.totalorder %s131_s22, %s219_s1  ;;  %p225_p2 = scmp.lt.s32.totalorder %s219_s1, %s219_s1 }
   0xc   :  { %199 = vmatpush3.bf16.msra.mxu0 %v198_v10  ;;  %p226_p3 = por %p225_p2, %p224_p1 }
   0xd   :  { %200 = vmatprep.subr.bf16.mxu0 %v243_v3 }
   0xe   :  { %p227_p4 = pnand %p226_p3, %p220_p0 }
  0x10   :  { %202 = vmatpush3.bf16.msra.mxu0 %v201_v13 }
  0x11   :  { %203 = vmatprep.subr.bf16.mxu0 %v243_v3 }
  0x14   :  { %205 = vmatpush3.bf16.msra.mxu0 %v204_v16 }
  0x15   :  { %206 = vmatprep.subr.bf16.mxu0 %v243_v3 }
  0x18   :  { %208 = vmatpush3.bf16.msra.mxu0 %v207_v19 }
  0x19   :  { %209 = vmatprep.subr.bf16.mxu0 %v243_v3 }
  0x1c   :  { %211 = vmatpush3.bf16.msra.mxu0 %v210_v22 }
  0x1d   :  { %212 = vmatprep.subr.bf16.mxu0 %v243_v3 }
  0x20   :  { %214 = vmatpush3.bf16.msra.mxu0 %v213_v25 }
  0x23   :  { %189 = vmatmul.mubr.f32.vlgmr.msra.gmra.mrb[0].mxu0 %v21_v26 }
  0xf6   :  { %v104_v28 = vpop.f32.mrb[0].mxu0 }
  0xf7   :  { %v121_v29 = vadd.f32 %v138_v27, %v104_v28  ;;  %v190_v30 = vpop.f32.mrb[1].mxu0 }
  0xf9   :  { %v122_v31 = vmax.f32 %v121_v29, 0.0 }
  0xfb   :  { %123 = vst [vmem:[#allocation3] sm:$0xff] %v122_v31 }
  0xfc   :  { %230 = shalt.err (!%p227_p4)
}
  0xfd   :  { %s231_s24 = scalar_lea.hbm %s336_s3, 128 }
  0xfe   :  { %p232_p5 = scmp.ne.s32.totalorder %s336_s3, %s231_s24  ;;  %p235_p6 = scmp.lt.u32.totalorder %s231_s24, %s336_s3 }
 0x100   :  { %p237_p7 = pnand %p235_p6, %p232_p5 }
 0x102   :  { %240 = shalt.err (!%p237_p7)
}
 0x103   :  { %133 = dma.vmem_to_hbm [thread:$0]  %s131_s22, 128, %s336_s3, [#allocation4]  }
 0x104   :  { %241 = dma.done.wait [#allocation4], 128  }
 0x105   :  { %242 = vsyncadd [#allocation4], 4294967168 }
 0x106   :  { %137 = vsyncpa [#allocation4], 1 }

</bundles_post_ra>
